<compile_context>
chip_gen: v7x
topology: tpu7x:2x2x1
jax: 0.10.0
libtpu: 0.0.40
codegen_flags: <defaults>
</compile_context>

<pallas_src>
import jax
import jax.numpy as jnp
from jax.experimental import pallas as pl
from jax.experimental.pallas import tpu as pltpu


def _normalizer_kernel(stats_ref, x_ref, o_ref):
    # stats_ref: SMEM (2,) f32 scalar-prefetch -> [running_mean, 1/sqrt(var)]
    mean = stats_ref[0]
    inv_std = stats_ref[1]
    xf = x_ref[...].astype(jnp.float32)
    o_ref[...] = ((xf - mean) * inv_std).astype(o_ref.dtype)


_SLAB_WIDTHS = (2048, 1024, 512, 256, 128)


def _pick_slab_width(total):
    """Largest lane width (multiple of 128) dividing `total`; prefer >=8 rows.

    Returns None when no width divides `total` (the unaligned / 1-D path).
    """
    fallback = None
    for w in _SLAB_WIDTHS:
        if total % w == 0:
            if total // w >= 8:
                return w
            if fallback is None:
                fallback = w
    return fallback


def _pick_block(n_units, unit_bytes, align, target_bytes,
                min_step_bytes=512 * 1024):
    """Block length in `units` (rows for the 2-D slab, elements for 1-D).

    Multiple of `align` unless it covers the full extent.  Targets
    ~`target_bytes` per input block, but forces >=2 grid steps (so "parallel"
    semantics can feed both v7x TensorCores) whenever each half-block still
    moves >= min_step_bytes, keeping the ~0.35us per-step overhead amortised.
    """
    per_target = max(align, target_bytes // unit_bytes)
    half = -(-n_units // 2)                      # ceil(n/2)
    min_units = max(align, min_step_bytes // unit_bytes)
    limit = half if half >= min_units else n_units
    blk = min(per_target, limit)
    if blk >= n_units:
        return n_units                           # full extent (always legal)
    return max(align, (blk // align) * align)


def scalar_normalizer_forward(x, running_mean, running_var, *,
                              block_target_bytes=4 * 1024 * 1024,
                              min_pallas_elems=64 * 1024,
                              out_dtype=None,
                              donate_x=False):
    """y = (x - running_mean) / sqrt(running_var), elementwise (eval forward)."""
    orig_shape = x.shape
    total = x.size
    if out_dtype is None:
        # Match PyTorch type promotion against the f32 BatchNorm buffers.
        out_dtype = jnp.promote_types(x.dtype, jnp.float32)
    out_dtype = jnp.dtype(out_dtype)

    mean = jnp.asarray(running_mean, jnp.float32).reshape(())
    var = jnp.asarray(running_var, jnp.float32).reshape(())
    inv_std = jax.lax.rsqrt(var)     # forward uses sqrt(var), no eps (as torch)

    # Small heads (e.g. (N,1) energies): fixed pallas_call dispatch would
    # dominate; a single fused XLA elementwise op is strictly faster.
    if total == 0 or total < min_pallas_elems:
        y = (x.astype(jnp.float32) - mean) * inv_std
        return y.astype(out_dtype)

    stats = jnp.stack([mean, inv_std])           # -> SMEM via scalar prefetch
    flat = x.reshape(-1)                         # free (metadata-only) reshape
    itemsize = jnp.dtype(x.dtype).itemsize
    cost = pl.CostEstimate(
        flops=2 * total,
        transcendentals=0,
        bytes_accessed=total * (itemsize + out_dtype.itemsize) + 8,
    )

    width = _pick_slab_width(total)
    if width is not None:
        # Aligned path: lane-dense 2-D slab, zero extra copies.
        rows = total // width
        operand = flat.reshape(rows, width)      # free reshape
        block_rows = _pick_block(rows, width * itemsize, 8, block_target_bytes)
        grid = (pl.cdiv(rows, block_rows),)
        block = (block_rows, width)
        index_map = lambda i, stats_ref: (i, 0)
        out_shape = jax.ShapeDtypeStruct((rows, width), out_dtype)
    else:
        # Unaligned path (common for (N,3) forces): 1-D blocks over the flat
        # view.  No jnp.pad / out[:total] passes; Pallas masks the ragged edge
        # block, so HBM traffic stays at one read + one write of the tensor.
        operand = flat
        block_elems = _pick_block(total, itemsize, 1024, block_target_bytes)
        grid = (pl.cdiv(total, block_elems),)
        block = (block_elems,)
        index_map = lambda i, stats_ref: (i,)
        out_shape = jax.ShapeDtypeStruct((total,), out_dtype)

    # Optional: alias x's buffer with the output when the caller donates x
    # (same shape/dtype).  Off by default so non-donating callers don't pay a
    # defensive copy inserted by XLA.
    aliases = {1: 0} if (donate_x and x.dtype == out_dtype) else {}

    out = pl.pallas_call(
        _normalizer_kernel,
        out_shape=out_shape,
        grid_spec=pltpu.PrefetchScalarGridSpec(
            num_scalar_prefetch=1,               # stats -> SMEM, loaded once
            grid=grid,
            in_specs=[pl.BlockSpec(block, index_map)],
            out_specs=pl.BlockSpec(block, index_map),
        ),
        compiler_params=pltpu.CompilerParams(
            dimension_semantics=("parallel",),   # shards steps on v7x megacore
            vmem_limit_bytes=48 * 1024 * 1024,   # 4 MiB blocks, double-buffered
        ),
        cost_estimate=cost,
        input_output_aliases=aliases,
    )(stats, operand)

    return out.reshape(orig_shape)


if __name__ == "__main__":
    # Deterministic "parameters" (module __init__ with init_mean / init_std):
    init_mean = 1.5
    init_std = 2.0
    running_mean = jnp.array(init_mean, jnp.float32)      # bn.running_mean=[1.5]
    running_var = jnp.array(init_std ** 2, jnp.float32)   # bn.running_var =[4.0]

    key = jax.random.PRNGKey(0)
    keys = jax.random.split(key, 6)

    def ref_fn(x):
        return (x.astype(jnp.float32) - running_mean) / jnp.sqrt(running_var)

    cases = [
        # (name, x, kwargs)
        # Small energy head -> jnp bypass path (no Pallas dispatch).
        ("energy_small_f32",
         jax.random.normal(keys[0], (250, 1), jnp.float32) * 2.0 - 0.5, {}),
        # Aligned total (3*4096 % 1024 == 0) -> lane-dense 2-D slab path.
        ("forces_aligned_2d",
         jax.random.normal(keys[1], (4096, 3), jnp.float32) * 3.0 + 1.0,
         dict(min_pallas_elems=0)),
        # Unaligned total (the common (N,3) case) -> 1-D path, no pad/slice.
        ("forces_unaligned_1d",
         jax.random.normal(keys[2], (2500, 3), jnp.float32) * 3.0 + 1.0,
         dict(min_pallas_elems=0)),
        # Unaligned + tiny blocks -> exercises the ragged 1-D edge block.
        ("forces_unaligned_ragged_grid",
         jax.random.normal(keys[3], (2500, 3), jnp.float32),
         dict(min_pallas_elems=0, block_target_bytes=4096)),
        # bf16 input -> f32 output (torch type promotion), 2-D slab path.
        ("slab_bf16",
         (jax.random.normal(keys[4], (64, 2048), jnp.float32) * 3.0 + 1.0
          ).astype(jnp.bfloat16), {}),
        # Ragged 2-D grid (rows % block_rows != 0) with tiny blocks.
        ("ragged_2d_grid",
         jax.random.normal(keys[5], (40, 128), jnp.float32),
         dict(min_pallas_elems=0, block_target_bytes=8 * 512 * 4)),
    ]

    for name, x, kwargs in cases:
        y = scalar_normalizer_forward(x, running_mean, running_var, **kwargs)
        y = jax.block_until_ready(y)

        y_ref = ref_fn(x)
        expected_dtype = jnp.promote_types(x.dtype, jnp.float32)
        assert y.shape == x.shape, name
        assert y.dtype == expected_dtype, name
        tol = 1e-2 if x.dtype == jnp.bfloat16 else 1e-5
        assert jnp.allclose(y.astype(jnp.float32), y_ref, atol=tol, rtol=tol), name

    print("KERNEL_OK")
</pallas_src>

<mosaic_0001>
module attributes {stable_mosaic.version = 11 : i64} {
  func.func @_normalizer_kernel(%arg0: i32, %arg1: memref<2xf32, #tpu.memory_space<smem>>, %arg2: memref<12x1024xf32, #tpu.memory_space<vmem>>, %arg3: memref<12x1024xf32, #tpu.memory_space<vmem>>) attributes {dimension_semantics = [#tpu.dimension_semantics<parallel>], iteration_bounds = array<i64: 1>, scalar_prefetch = 1 : i64, scratch_operands = 0 : i64, tpu.core_type = #tpu.core_type<tc>, window_params = [{transform_indices = @transform_0, window_bounds = array<i64: 12, 1024>}, {transform_indices = @transform_1, window_bounds = array<i64: 12, 1024>}]} {
    %c0 = arith.constant 0 : index
    %0 = memref.load %arg1[%c0] : memref<2xf32, #tpu.memory_space<smem>>
    %c1 = arith.constant 1 : index
    %1 = memref.load %arg1[%c1] : memref<2xf32, #tpu.memory_space<smem>>
    %c0_0 = arith.constant 0 : index
    %c0_1 = arith.constant 0 : index
    %2 = vector.load %arg2[%c0_0, %c0_1] : memref<12x1024xf32, #tpu.memory_space<vmem>>, vector<12x1024xf32>
    %3 = vector.broadcast %0 : f32 to vector<12x1024xf32>
    %4 = arith.subf %2, %3 : vector<12x1024xf32>
    %5 = vector.broadcast %1 : f32 to vector<12x1024xf32>
    %6 = arith.mulf %4, %5 : vector<12x1024xf32>
    %c0_2 = arith.constant 0 : index
    %c0_3 = arith.constant 0 : index
    %7 = vector.load %arg3[%c0_2, %c0_3] : memref<12x1024xf32, #tpu.memory_space<vmem>>, vector<12x1024xf32>
    tpu.vector_store %arg3[%c0_2, %c0_3], %6 {strides = array<i32>} : memref<12x1024xf32, #tpu.memory_space<vmem>>, vector<12x1024xf32>,
    return
  }
  func.func @transform_0(%arg0: i32, %arg1: memref<2xf32, #tpu.memory_space<smem>>) -> (i32, i32) {
    %c0_i32 = arith.constant 0 : i32
    %c0_i32_0 = arith.constant 0 : i32
    return %arg0, %c0_i32 : i32, i32
  }
  func.func @transform_1(%arg0: i32, %arg1: memref<2xf32, #tpu.memory_space<smem>>) -> (i32, i32) {
    %c0_i32 = arith.constant 0 : i32
    %c0_i32_0 = arith.constant 0 : i32
    return %arg0, %c0_i32 : i32, i32
  }
}

</mosaic_0001>

<bundles_post_ra>
// kernel: tpu_custom_call.1
= control target key start
LH: loop header
LB: loop body
LE: loop exit
PB: predicated region body
PF: predicated region fallthrough
CT: control target
= control target key end

     0   :  { %s277_s0 = inlined_call_operand.hbm [shape: f32[2], index: 0, kind: input, shape index: {}]   ;;  %s278_s1 = inlined_call_operand.hbm [shape: f32[12,1024], index: 1, kind: input, shape index: {}]   ;;  %s279_s2 = inlined_call_operand.hbm [shape: f32[12,1024], index: 2, kind: output, shape index: {}]  }
   0x1   :  { %s119_s11 = scalar_lea.hbm %s277_s0, 16 }
   0x2   :  { %p120_p0 = scmp.ne.s32.totalorder %s277_s0, %s119_s11  ;;  %p123_p1 = scmp.lt.u32.totalorder %s119_s11, %s277_s0 }
   0x4   :  { %p125_p2 = pnand %p123_p1, %p120_p0 }
   0x6   :  { %128 = shalt.err (!%p125_p2)  }
   0x7   :  { %s179_s16 = smov [#allocation3]  }
   0x8   :  { %8 = dma.hbm_to_smem %s277_s0, 16, %s179_s16, [#allocation2] }
   0x9   :  { %173 = dma.done.wait [#allocation2], 16 }
   0xa   :  { %174 = vsyncadd [#allocation2], 4294967280 }
   0xb   :  { %10 = sfence }
   0xc   :  { %11 = vsyncpa [#allocation5], 0 }
   0xd   :  { %12 = vsyncpa [#allocation6], 0  ;;  %s180_s19 = smov [#allocation4]   ;;  %s129_s23 = scalar_lea.hbm %s278_s1, 2048 }
   0xe   :  { %s18_s20 = sshll.u32 %s180_s19, 4  ;;  %p130_p3 = scmp.ne.s32.totalorder %s278_s1, %s129_s23  ;;  %s19_s20 = int_to_ptr.vmem [resolvable:$true] %s18_s20 }
   0xf   :  { %p133_p4 = scmp.lt.u32.totalorder %s129_s23, %s278_s1 }
  0x11   :  { %p135_p5 = pnand %p133_p4, %p130_p3 }
  0x13   :  { %138 = shalt.err (!%p135_p5)
}
  0x14   :  { %s139_s0 = scalar_lea.vmem %s19_s20, 2048  ;;  %p144_p7 = scmp.lt.s32.totalorder %s19_s20, %s19_s20 }
  0x15   :  { %p140_p6 = scmp.ne.s32.totalorder %s19_s20, %s139_s0  ;;  %p145_p8 = scmp.lt.s32.totalorder %s139_s0, %s139_s0 }
  0x17   :  { %p146_p9 = por %p145_p8, %p144_p7 }
  0x19   :  { %p147_p10 = pnand %p146_p9, %p140_p6 }
  0x1b   :  { %150 = shalt.err (!%p147_p10)
}
  0x1c   :  { %s181_s28 = smov 1024   ;;  %s182_s29 = smov 64  }
  0x1d   :  { %24 = dma.hbm_to_vmem [thread:$0]  %s278_s1, 2048, %s19_s20, [#allocation5], %s181_s28, %s181_s28, %s182_s29  }
  0x1e   :  { %175 = dma.done.wait [#allocation5], 2048  }
  0x1f   :  { %176 = vsyncadd [#allocation5], 4294965248  ;;  %s28_s4 = sld [smem:[#allocation3]]  ;;  %s113_s5 = sld [smem:[#allocation3 + $0x1]]  ;;  %v30_v0 = vld [vmem:[#allocation4] sm:$0xff]  ;;  %v31_v3 = vld [vmem:[#allocation4 + $0x8] sm:$0xff] }
  0x20   :  { %v32_v4 = vld [vmem:[#allocation4 + $0x10] sm:$0xff]  ;;  %v33_v8 = vld [vmem:[#allocation4 + $0x18] sm:$0xff]  ;;  %v34_v9 = vld [vmem:[#allocation4 + $0x20] sm:$0xff]  ;;  %s183_s1 = smov [#allocation7]  }
  0x21   :  { %v35_v10 = vld [vmem:[#allocation4 + $0x28] sm:$0xff]  ;;  %v36_v14 = vld [vmem:[#allocation4 + $0x30] sm:$0xff]  ;;  %v37_v15 = vld [vmem:[#allocation4 + $0x38] sm:$0xff]  ;;  %s101_s6 = sshll.u32 %s183_s1, 4  ;;  %s102_s6 = int_to_ptr.vmem [resolvable:$true] %s101_s6 }
  0x22   :  { %v38_v16 = vld [vmem:[#allocation4 + $0x40] sm:$0xf]  ;;  %v39_v21 = vld [vmem:[#allocation4 + $0x48] sm:$0xf]  ;;  %v40_v22 = vld [vmem:[#allocation4 + $0x50] sm:$0xf]  ;;  %p156_p12 = scmp.lt.s32.totalorder %s102_s6, %s102_s6 }
  0x23   :  { %v41_v23 = vld [vmem:[#allocation4 + $0x58] sm:$0xf]  ;;  %v42_v28 = vld [vmem:[#allocation4 + $0x60] sm:$0xf]  ;;  %v43_v29 = vld [vmem:[#allocation4 + $0x68] sm:$0xf] }
  0x24   :  { %v44_v30 = vld [vmem:[#allocation4 + $0x70] sm:$0xf]  ;;  %v45_v35 = vld [vmem:[#allocation4 + $0x78] sm:$0xf]  ;;  %s151_s7 = scalar_lea.vmem %s102_s6, 2048 }
  0x25   :  { %v226_v1 = vstv %s28_s4  ;;  %v228_v2 = vstv %s113_s5  ;;  %p152_p11 = scmp.ne.s32.totalorder %s102_s6, %s151_s7  ;;  %p157_p13 = scmp.lt.s32.totalorder %s151_s7, %s151_s7 }
  0x26   :  { %v47_v5 = vsub.f32 %v30_v0, %v226_v1  ;;  %v48_v6 = vsub.f32 %v31_v3, %v226_v1  ;;  %v49_v7 = vsub.f32 %v32_v4, %v226_v1  ;;  %v50_v11 = vsub.f32 %v33_v8, %v226_v1 }
  0x27   :  { %v51_v12 = vsub.f32 %v34_v9, %v226_v1  ;;  %v52_v13 = vsub.f32 %v35_v10, %v226_v1  ;;  %v53_v20 = vsub.f32 %v36_v14, %v226_v1  ;;  %v54_v27 = vsub.f32 %v37_v15, %v226_v1  ;;  %p158_p0 = por %p157_p13, %p156_p12 }
  0x28   :  { %v64_v17 = vmul.f32 %v228_v2, %v47_v5  ;;  %v65_v18 = vmul.f32 %v228_v2, %v48_v6  ;;  %v66_v19 = vmul.f32 %v228_v2, %v49_v7  ;;  %v67_v24 = vmul.f32 %v228_v2, %v50_v11 }
  0x29   :  { %v68_v25 = vmul.f32 %v228_v2, %v51_v12  ;;  %v69_v26 = vmul.f32 %v228_v2, %v52_v13  ;;  %v70_v31 = vmul.f32 %v228_v2, %v53_v20  ;;  %v55_v32 = vsub.f32 %v38_v16, %v226_v1  ;;  %p159_p1 = pnand %p158_p0, %p152_p11 }
  0x2a   :  { %80 = vst [vmem:[#allocation7] sm:$0xff] %v64_v17  ;;  %81 = vst [vmem:[#allocation7 + $0x8] sm:$0xff] %v65_v18  ;;  %v56_v33 = vsub.f32 %v39_v21, %v226_v1  ;;  %v57_v34 = vsub.f32 %v40_v22, %v226_v1  ;;  %v71_v36 = vmul.f32 %v228_v2, %v54_v27 }
  0x2b   :  { %82 = vst [vmem:[#allocation7 + $0x10] sm:$0xff] %v66_v19  ;;  %83 = vst [vmem:[#allocation7 + $0x18] sm:$0xff] %v67_v24  ;;  %v58_v37 = vsub.f32 %v41_v23, %v226_v1  ;;  %v59_v38 = vsub.f32 %v42_v28, %v226_v1  ;;  %v60_v39 = vsub.f32 %v43_v29, %v226_v1 }
  0x2c   :  { %84 = vst [vmem:[#allocation7 + $0x20] sm:$0xff] %v68_v25  ;;  %85 = vst [vmem:[#allocation7 + $0x28] sm:$0xff] %v69_v26  ;;  %v72_v40 = vmul.f32 %v228_v2, %v55_v32  ;;  %v73_v41 = vmul.f32 %v228_v2, %v56_v33  ;;  %v74_v42 = vmul.f32 %v228_v2, %v57_v34 }
  0x2d   :  { %86 = vst [vmem:[#allocation7 + $0x30] sm:$0xff] %v70_v31  ;;  %v61_v43 = vsub.f32 %v44_v30, %v226_v1  ;;  %87 = vst [vmem:[#allocation7 + $0x38] sm:$0xff] %v71_v36  ;;  %v75_v44 = vmul.f32 %v228_v2, %v58_v37  ;;  %v76_v45 = vmul.f32 %v228_v2, %v59_v38 }
  0x2e   :  { %v77_v46 = vmul.f32 %v228_v2, %v60_v39  ;;  %v62_v47 = vsub.f32 %v45_v35, %v226_v1  ;;  %88 = vst [vmem:[#allocation7 + $0x40] sm:$0xf] %v72_v40  ;;  %89 = vst [vmem:[#allocation7 + $0x48] sm:$0xf] %v73_v41 }
  0x2f   :  { %90 = vst [vmem:[#allocation7 + $0x50] sm:$0xf] %v74_v42  ;;  %v78_v48 = vmul.f32 %v228_v2, %v61_v43  ;;  %91 = vst [vmem:[#allocation7 + $0x58] sm:$0xf] %v75_v44 }
  0x30   :  { %92 = vst [vmem:[#allocation7 + $0x60] sm:$0xf] %v76_v45  ;;  %93 = vst [vmem:[#allocation7 + $0x68] sm:$0xf] %v77_v46  ;;  %v79_v49 = vmul.f32 %v228_v2, %v62_v47 }
  0x31   :  { %94 = vst [vmem:[#allocation7 + $0x70] sm:$0xf] %v78_v48 }
  0x32   :  { %95 = vst [vmem:[#allocation7 + $0x78] sm:$0xf] %v79_v49 }
  0x33   :  { %162 = shalt.err (!%p159_p1)
}
  0x34   :  { %s163_s10 = scalar_lea.hbm %s279_s2, 2048 }
  0x35   :  { %p164_p2 = scmp.ne.s32.totalorder %s279_s2, %s163_s10  ;;  %p167_p3 = scmp.lt.u32.totalorder %s163_s10, %s279_s2 }
  0x37   :  { %p169_p4 = pnand %p167_p3, %p164_p2 }
  0x39   :  { %172 = shalt.err (!%p169_p4)
}
  0x3a   :  { %107 = dma.vmem_to_hbm [thread:$0]  %s102_s6, 2048, %s279_s2, [#allocation6], %s181_s28, %s181_s28, %s182_s29  }
  0x3b   :  { %177 = dma.done.wait [#allocation6], 2048  }
  0x3c   :  { %178 = vsyncadd [#allocation6], 4294965248 }
  0x3d   :  { %111 = vsyncpa [#allocation5], 1 }
  0x3e   :  { %112 = vsyncpa [#allocation6], 1 }

</bundles_post_ra>
